<compile_context>
chip_gen: v6e
topology: v6e:2x2x1
jax: 0.10.0
libtpu: 0.0.40
codegen_flags: <defaults>
</compile_context>

<pallas_src>
import jax
import jax.numpy as jnp
from jax.experimental import pallas as pl
from jax.experimental.pallas import tpu as pltpu


_NEG_BIG = -1e10                                   # PyTorch masked_fill value
_PAD_FILL = float(jnp.finfo(jnp.float32).min)      # S-padding columns -> exactly 0 weight


def _attention_kernel(hidden_ref, enc_ref, mask_ref,
                      wh_ref, we_ref, b_ref, v_ref, out_ref):
    """One TB-row batch block per grid step.

    hidden_ref: [TB, Dd]      decoder hidden rows (f32)
    enc_ref:    [S, TB, E2]   encoder outputs, native seq-major layout (f32 or bf16)
    mask_ref:   [TB, S]       1.0 = valid token, 0.0 = padding (f32)
    wh_ref:     [Dd, Dd]      hidden part of the concat-Linear weight (resident)
    we_ref:     [E2, Dd]      encoder part of the concat-Linear weight (resident)
    b_ref:      [1, Dd]       concat-Linear bias (resident)
    v_ref:      [1, Dd]       v-projection weight, no bias (resident)
    out_ref:    [TB, S_pad]   softmax attention weights (lane-dense store)

    Fully-masked rows produce a uniform distribution over the S real positions,
    matching PyTorch's masked_fill(-1e10) + softmax behaviour.
    """
    S, TB, E2 = enc_ref.shape
    Dd = wh_ref.shape[0]
    S_pad = out_ref.shape[1]

    # Hidden-side projection + bias: one small MXU matmul per batch block.
    hb = jnp.dot(hidden_ref[...], wh_ref[...],
                 preferred_element_type=jnp.float32) + b_ref[...]          # [TB, Dd]

    # Encoder-side projection: single 2-D MXU matmul with M = S*TB.
    enc2 = enc_ref[...].reshape(S * TB, E2)
    e_proj = jnp.dot(enc2, we_ref[...],
                     preferred_element_type=jnp.float32)                   # [S*TB, Dd]
    e_proj = e_proj.reshape(S, TB, Dd)

    energy = jnp.tanh(e_proj + hb[None, :, :])                             # [S, TB, Dd]

    # v-projection: VPU multiply + lane reduction (free slots in this HBM-bound
    # kernel), then a tiny [S, TB] -> [TB, S] transpose so the output store is
    # batch-major and lane-dense.
    scores = jnp.sum(energy * v_ref[...][None, :, :], axis=-1)             # [S, TB]
    scores = scores.T                                                      # [TB, S]

    # masked_fill(mask == 0, -1e10): keep the exact replace semantics (not an
    # additive bias) so fully-masked rows stay uniform like PyTorch.
    scores = jnp.where(mask_ref[...] == 0.0, jnp.float32(_NEG_BIG), scores)

    # Pad src_len up to the lane-dense output width; padded columns get exactly
    # zero probability mass.
    if S_pad > S:
        pad = jnp.full((TB, S_pad - S), _PAD_FILL, jnp.float32)
        scores = jnp.concatenate([scores, pad], axis=-1)                   # [TB, S_pad]

    # Numerically stable softmax over src_len (lane axis); exact division so rows
    # sum to 1 to float precision (the divide is hidden under the DMA anyway).
    m = jnp.max(scores, axis=1, keepdims=True)
    ex = jnp.exp(scores - m)
    denom = jnp.sum(ex, axis=1, keepdims=True)
    out_ref[...] = ex / denom


def _choose_batch_block(B, S, E2, itemsize):
    """Pick TB = batch rows per grid step.

    Constraints: TB divides B and (TB == B or TB % 8 == 0) so every block's
    second-minor dim is either the full array dim or a multiple of 8.
    Keeps >= 2 grid steps when B is large (v7x has 2 TensorCores) and sizes the
    double-buffered encoder block conservatively against v7x's 64 MiB VMEM.
    """
    budget = 12 * 1024 * 1024  # per-buffer budget for the enc block
    if B <= 8:
        return B
    def fits(tb):
        return tb * S * E2 * itemsize <= budget
    cands = [tb for tb in range(8, B // 2 + 1, 8) if B % tb == 0 and fits(tb)]
    if cands:
        return max(cands)
    if B % 8 == 0 and fits(8):
        return 8
    return B
    # TODO(synk): for very long src_len where even one batch row's encoder slab
    # cannot fit double-buffered in VMEM, add an S-tile grid axis ("arbitrary")
    # with an online-softmax accumulator instead of a single (S, TB, E2) block.


def attention_pallas(hidden, encoder_outputs, mask, w_attn, b_attn, w_v):
    """
    hidden:          [B, Dd]          decoder hidden state
    encoder_outputs: [S, B, 2*De]     native PyTorch layout (float32 or bfloat16)
    mask:            [B, S]           nonzero == valid token
    w_attn:          [Dd, 2*De + Dd]  nn.Linear weight layout
    b_attn:          [Dd]
    w_v:             [1, Dd]          nn.Linear weight layout (no bias)
    returns:         [B, S] float32 softmax attention weights
    """
    S, B, E2 = encoder_outputs.shape
    Dd = hidden.shape[1]

    # Consume the encoder tensor in its producer dtype: no wrapper-side cast or
    # transpose pass over the largest tensor.
    enc_dtype = encoder_outputs.dtype
    if enc_dtype not in (jnp.bfloat16, jnp.float32):
        encoder_outputs = encoder_outputs.astype(jnp.float32)
        enc_dtype = jnp.float32

    # Split the concat-Linear: Linear(cat(h, enc)) = h @ Wh + enc @ We + b.
    wh = jnp.transpose(w_attn[:, :Dd]).astype(jnp.float32)       # [Dd, Dd]
    we = jnp.transpose(w_attn[:, Dd:]).astype(enc_dtype)         # [E2, Dd]
    b2 = b_attn.reshape(1, Dd).astype(jnp.float32)
    v2 = w_v.reshape(1, Dd).astype(jnp.float32)

    hidden = hidden.astype(jnp.float32)
    maskf = (mask != 0).astype(jnp.float32)                      # [B, S]

    itemsize = jnp.dtype(enc_dtype).itemsize
    TB = _choose_batch_block(B, S, E2, itemsize)
    num_blocks = B // TB

    # Lane-dense, unmasked output store width.
    S_pad = max(128, ((S + 127) // 128) * 128)

    # VMEM budget: double-buffered blocks + resident (but double-allocated) weights,
    # with generous headroom; default scoped VMEM (16/32 MiB) is otherwise the cap.
    vmem_need = (2 * (TB * S * E2 * itemsize
                      + 4 * (TB * Dd + TB * S + TB * S_pad))
                 + 2 * 4 * (Dd * Dd + E2 * Dd + 2 * Dd))
    vmem_limit = int(min(max(4 * vmem_need, 32 << 20), 96 << 20))

    out = pl.pallas_call(
        _attention_kernel,
        out_shape=jax.ShapeDtypeStruct((B, S_pad), jnp.float32),
        grid=(num_blocks,),
        in_specs=[
            pl.BlockSpec((TB, Dd), lambda i: (i, 0)),         # hidden rows
            pl.BlockSpec((S, TB, E2), lambda i: (0, i, 0)),   # enc rows, native [S,B,E2]
            pl.BlockSpec((TB, S), lambda i: (i, 0)),          # mask rows (f32)
            pl.BlockSpec((Dd, Dd), lambda i: (0, 0)),         # Wh   (resident)
            pl.BlockSpec((E2, Dd), lambda i: (0, 0)),         # We   (resident)
            pl.BlockSpec((1, Dd), lambda i: (0, 0)),          # bias (resident)
            pl.BlockSpec((1, Dd), lambda i: (0, 0)),          # v    (resident)
        ],
        out_specs=pl.BlockSpec((TB, S_pad), lambda i: (i, 0)),
        compiler_params=pltpu.CompilerParams(
            dimension_semantics=("parallel",),
            vmem_limit_bytes=vmem_limit),
    )(hidden, encoder_outputs, maskf, wh, we, b2, v2)

    return out[:, :S]


def attention_ref(hidden, encoder_outputs, mask, w_attn, b_attn, w_v):
    """Pure-JAX reference mirroring the PyTorch forward exactly."""
    S = encoder_outputs.shape[0]
    h_rep = jnp.repeat(hidden.astype(jnp.float32)[:, None, :], S, axis=1)
    enc = jnp.transpose(encoder_outputs.astype(jnp.float32), (1, 0, 2))
    cat = jnp.concatenate([h_rep, enc], axis=2)
    energy = jnp.tanh(cat @ w_attn.T + b_attn)
    att = (energy @ w_v.T)[..., 0]
    att = jnp.where(mask == 0, -1e10, att)
    return jax.nn.softmax(att, axis=1)


if __name__ == "__main__":
    enc_hid_dim = 16
    dec_hid_dim = 32
    B, S = 4, 10
    E2 = enc_hid_dim * 2

    key = jax.random.PRNGKey(0)
    k1, k2, k3, k4, k5 = jax.random.split(key, 5)

    hidden = jax.random.normal(k1, (B, dec_hid_dim), jnp.float32)
    encoder_outputs = jax.random.normal(k2, (S, B, E2), jnp.float32)
    # mask: 1 for valid tokens, 0 for padding
    mask = jnp.ones((B, S), jnp.int32)
    mask = mask.at[1, 7:].set(0).at[3, 4:].set(0)

    # deterministic parameters (shapes from the nn.Linear definitions)
    w_attn = 0.1 * jax.random.normal(k3, (dec_hid_dim, E2 + dec_hid_dim), jnp.float32)
    b_attn = 0.1 * jax.random.normal(k4, (dec_hid_dim,), jnp.float32)
    w_v = 0.1 * jax.random.normal(k5, (1, dec_hid_dim), jnp.float32)

    ref = attention_ref(hidden, encoder_outputs, mask, w_attn, b_attn, w_v)

    # f32 path
    out = attention_pallas(hidden, encoder_outputs, mask, w_attn, b_attn, w_v)
    out = jax.block_until_ready(out)
    assert out.shape == (B, S)
    assert jnp.allclose(out, ref, atol=1e-3, rtol=1e-3), (out, ref)
    assert jnp.allclose(jnp.sum(out, axis=1), 1.0, atol=1e-3)

    # bf16-producer path: encoder outputs arrive already in bf16 (no wrapper cast);
    # the dominant HBM stream halves while tanh / softmax stay f32.
    enc_bf16 = encoder_outputs.astype(jnp.bfloat16)
    ref_bf16 = attention_ref(hidden, enc_bf16, mask, w_attn, b_attn, w_v)
    out_bf16 = attention_pallas(hidden, enc_bf16, mask, w_attn, b_attn, w_v)
    out_bf16 = jax.block_until_ready(out_bf16)
    assert jnp.all(jnp.isfinite(out_bf16))
    assert jnp.allclose(out_bf16, ref_bf16, atol=3e-2, rtol=3e-2)
    assert jnp.allclose(jnp.sum(out_bf16, axis=1), 1.0, atol=1e-3)

    print("KERNEL_OK")
</pallas_src>

<mosaic_0001>
module attributes {stable_mosaic.version = 11 : i64} {
  func.func @_attention_kernel(%arg0: i32, %arg1: memref<4x32xf32, #tpu.memory_space<vmem>>, %arg2: memref<10x4x32xf32, #tpu.memory_space<vmem>>, %arg3: memref<4x10xf32, #tpu.memory_space<vmem>>, %arg4: memref<32x32xf32, #tpu.memory_space<vmem>>, %arg5: memref<32x32xf32, #tpu.memory_space<vmem>>, %arg6: memref<1x32xf32, #tpu.memory_space<vmem>>, %arg7: memref<1x32xf32, #tpu.memory_space<vmem>>, %arg8: memref<4x128xf32, #tpu.memory_space<vmem>>) attributes {dimension_semantics = [#tpu.dimension_semantics<parallel>], iteration_bounds = array<i64: 1>, scalar_prefetch = 0 : i64, scratch_operands = 0 : i64, tpu.core_type = #tpu.core_type<tc>, window_params = [{transform_indices = @transform_0, window_bounds = array<i64: 4, 32>}, {transform_indices = @transform_1, window_bounds = array<i64: 10, 4, 32>}, {transform_indices = @transform_2, window_bounds = array<i64: 4, 10>}, {pipeline_mode = #tpu.pipeline_mode<synchronous>, transform_indices = @transform_3, window_bounds = array<i64: 32, 32>}, {pipeline_mode = #tpu.pipeline_mode<synchronous>, transform_indices = @transform_4, window_bounds = array<i64: 32, 32>}, {pipeline_mode = #tpu.pipeline_mode<synchronous>, transform_indices = @transform_5, window_bounds = array<i64: 1, 32>}, {pipeline_mode = #tpu.pipeline_mode<synchronous>, transform_indices = @transform_6, window_bounds = array<i64: 1, 32>}, {transform_indices = @transform_7, window_bounds = array<i64: 4, 128>}]} {
    %c0 = arith.constant 0 : index
    %c0_0 = arith.constant 0 : index
    %0 = vector.load %arg1[%c0, %c0_0] : memref<4x32xf32, #tpu.memory_space<vmem>>, vector<4x32xf32>
    %c0_1 = arith.constant 0 : index
    %c0_2 = arith.constant 0 : index
    %1 = vector.load %arg4[%c0_1, %c0_2] : memref<32x32xf32, #tpu.memory_space<vmem>>, vector<32x32xf32>
    %cst = arith.constant dense<0.000000e+00> : vector<4x32xf32>
    %2 = tpu.matmul %0, %1, %cst {dimension_numbers = #tpu.dot_dimension_numbers<[1], [0], [0], [1], [0, 0, 1, 1], [], []>} : vector<4x32xf32>, vector<32x32xf32>, vector<4x32xf32> -> vector<4x32xf32>
    %c0_3 = arith.constant 0 : index
    %c0_4 = arith.constant 0 : index
    %3 = vector.load %arg6[%c0_3, %c0_4] : memref<1x32xf32, #tpu.memory_space<vmem>>, vector<1x32xf32>
    %4 = vector.broadcast %3 : vector<1x32xf32> to vector<4x32xf32>
    %5 = arith.addf %2, %4 : vector<4x32xf32>
    %c0_5 = arith.constant 0 : index
    %c0_6 = arith.constant 0 : index
    %c0_7 = arith.constant 0 : index
    %6 = vector.load %arg2[%c0_5, %c0_6, %c0_7] : memref<10x4x32xf32, #tpu.memory_space<vmem>>, vector<10x4x32xf32>
    %7 = vector.shape_cast %6 : vector<10x4x32xf32> to vector<40x32xf32>
    %c0_8 = arith.constant 0 : index
    %c0_9 = arith.constant 0 : index
    %8 = vector.load %arg5[%c0_8, %c0_9] : memref<32x32xf32, #tpu.memory_space<vmem>>, vector<32x32xf32>
    %cst_10 = arith.constant dense<0.000000e+00> : vector<40x32xf32>
    %9 = tpu.matmul %7, %8, %cst_10 {dimension_numbers = #tpu.dot_dimension_numbers<[1], [0], [0], [1], [0, 0, 1, 1], [], []>} : vector<40x32xf32>, vector<32x32xf32>, vector<40x32xf32> -> vector<40x32xf32>
    %10 = vector.shape_cast %9 : vector<40x32xf32> to vector<10x4x32xf32>
    %11 = vector.shape_cast %5 : vector<4x32xf32> to vector<1x4x32xf32>
    %12 = vector.broadcast %11 : vector<1x4x32xf32> to vector<10x4x32xf32>
    %13 = arith.addf %10, %12 : vector<10x4x32xf32>
    %14 = math.tanh %13 : vector<10x4x32xf32>
    %c0_11 = arith.constant 0 : index
    %c0_12 = arith.constant 0 : index
    %15 = vector.load %arg7[%c0_11, %c0_12] : memref<1x32xf32, #tpu.memory_space<vmem>>, vector<1x32xf32>
    %16 = vector.shape_cast %15 : vector<1x32xf32> to vector<1x1x32xf32>
    %17 = vector.broadcast %16 : vector<1x1x32xf32> to vector<10x4x32xf32>
    %18 = arith.mulf %14, %17 : vector<10x4x32xf32>
    %cst_13 = arith.constant dense<0.000000e+00> : vector<10x4xf32>
    %19 = vector.multi_reduction <add>, %18, %cst_13 [2] : vector<10x4x32xf32> to vector<10x4xf32>
    %20 = tpu.transpose %19, [1, 0] : vector<10x4xf32> -> vector<4x10xf32>
    %c0_14 = arith.constant 0 : index
    %c0_15 = arith.constant 0 : index
    %21 = vector.load %arg3[%c0_14, %c0_15] : memref<4x10xf32, #tpu.memory_space<vmem>>, vector<4x10xf32>
    %cst_16 = arith.constant 0.000000e+00 : f32
    %22 = vector.broadcast %cst_16 : f32 to vector<4x10xf32>
    %23 = arith.cmpf oeq, %21, %22 : vector<4x10xf32>
    %cst_17 = arith.constant -1.000000e+10 : f32
    %24 = vector.broadcast %cst_17 : f32 to vector<4x10xf32>
    %25 = arith.select %23, %24, %20 : vector<4x10xi1>, vector<4x10xf32>
    %cst_18 = arith.constant -3.40282347E+38 : f32
    %26 = vector.broadcast %cst_18 : f32 to vector<4x118xf32>
    %27 = tpu.concatenate %25, %26 in 1 : vector<4x10xf32>, vector<4x118xf32> -> vector<4x128xf32>
    %cst_19 = arith.constant dense<0xFF800000> : vector<4xf32>
    %28 = vector.multi_reduction <maximumf>, %27, %cst_19 [1] : vector<4x128xf32> to vector<4xf32>
    %29 = vector.shape_cast %28 : vector<4xf32> to vector<4x1xf32>
    %30 = vector.broadcast %29 : vector<4x1xf32> to vector<4x128xf32>
    %31 = arith.subf %27, %30 : vector<4x128xf32>
    %32 = math.exp %31 : vector<4x128xf32>
    %cst_20 = arith.constant dense<0.000000e+00> : vector<4xf32>
    %33 = vector.multi_reduction <add>, %32, %cst_20 [1] : vector<4x128xf32> to vector<4xf32>
    %34 = vector.shape_cast %33 : vector<4xf32> to vector<4x1xf32>
    %35 = vector.broadcast %34 : vector<4x1xf32> to vector<4x128xf32>
    %36 = arith.divf %32, %35 : vector<4x128xf32>
    %c0_21 = arith.constant 0 : index
    %c0_22 = arith.constant 0 : index
    %37 = vector.load %arg8[%c0_21, %c0_22] : memref<4x128xf32, #tpu.memory_space<vmem>>, vector<4x128xf32>
    tpu.vector_store %arg8[%c0_21, %c0_22], %36 {strides = array<i32>} : memref<4x128xf32, #tpu.memory_space<vmem>>, vector<4x128xf32>,
    return
  }
  func.func @transform_0(%arg0: i32) -> (i32, i32) {
    %c0_i32 = arith.constant 0 : i32
    %c0_i32_0 = arith.constant 0 : i32
    return %arg0, %c0_i32 : i32, i32
  }
  func.func @transform_1(%arg0: i32) -> (i32, i32, i32) {
    %c0_i32 = arith.constant 0 : i32
    %c0_i32_0 = arith.constant 0 : i32
    %c0_i32_1 = arith.constant 0 : i32
    return %c0_i32, %arg0, %c0_i32_0 : i32, i32, i32
  }
  func.func @transform_2(%arg0: i32) -> (i32, i32) {
    %c0_i32 = arith.constant 0 : i32
    %c0_i32_0 = arith.constant 0 : i32
    return %arg0, %c0_i32 : i32, i32
  }
  func.func @transform_3(%arg0: i32) -> (i32, i32) {
    %c0_i32 = arith.constant 0 : i32
    %c0_i32_0 = arith.constant 0 : i32
    %c0_i32_1 = arith.constant 0 : i32
    return %c0_i32, %c0_i32_0 : i32, i32
  }
  func.func @transform_4(%arg0: i32) -> (i32, i32) {
    %c0_i32 = arith.constant 0 : i32
    %c0_i32_0 = arith.constant 0 : i32
    %c0_i32_1 = arith.constant 0 : i32
    return %c0_i32, %c0_i32_0 : i32, i32
  }
  func.func @transform_5(%arg0: i32) -> (i32, i32) {
    %c0_i32 = arith.constant 0 : i32
    %c0_i32_0 = arith.constant 0 : i32
    %c0_i32_1 = arith.constant 0 : i32
    return %c0_i32, %c0_i32_0 : i32, i32
  }
  func.func @transform_6(%arg0: i32) -> (i32, i32) {
    %c0_i32 = arith.constant 0 : i32
    %c0_i32_0 = arith.constant 0 : i32
    %c0_i32_1 = arith.constant 0 : i32
    return %c0_i32, %c0_i32_0 : i32, i32
  }
  func.func @transform_7(%arg0: i32) -> (i32, i32) {
    %c0_i32 = arith.constant 0 : i32
    %c0_i32_0 = arith.constant 0 : i32
    return %arg0, %c0_i32 : i32, i32
  }
}

</mosaic_0001>

<bundles_post_ra>
// kernel: tpu_custom_call.1
= control target key start
LH: loop header
LB: loop body
LE: loop exit
PB: predicated region body
PF: predicated region fallthrough
CT: control target
= control target key end

     0   :  { %12 = vsyncpa [#allocation3], 0  ;;  %s864_s0 = inlined_call_operand.hbm [shape: f32[4,32], index: 0, kind: input, shape index: {}]   ;;  %s865_s1 = inlined_call_operand.hbm [shape: f32[10,4,32], index: 1, kind: input, shape index: {}]   ;;  %s866_s2 = inlined_call_operand.hbm [shape: f32[4,10], index: 2, kind: input, shape index: {}]   ;;  %s867_s3 = inlined_call_operand.hbm [shape: f32[32,32], index: 3, kind: input, shape index: {}]   ;;  %s868_s4 = inlined_call_operand.hbm [shape: f32[32,32], index: 4, kind: input, shape index: {}]   ;;  %s869_s5 = inlined_call_operand.vmem [shape: f32[1,32], index: 5, kind: input, shape index: {}]   ;;  %s870_s6 = inlined_call_operand.vmem [shape: f32[1,32], index: 6, kind: input, shape index: {}]   ;;  %s871_s7 = inlined_call_operand.hbm [shape: f32[4,128], index: 7, kind: output, shape index: {}]  }
   0x1   :  { %13 = vsyncpa [#allocation6], 0 }
   0x2   :  { %14 = vsyncpa [#allocation9], 0 }
   0x3   :  { %15 = vsyncpa [#allocation4], 0  ;;  %s758_s24 = smov [#allocation5]  }
   0x4   :  { %s31_s25 = sshll.u32 %s758_s24, 4  ;;  %s32_s25 = int_to_ptr.vmem [resolvable:$true] %s31_s25 }
   0x5   :  { %s638_s26 = scalar_lea.vmem %s32_s25, 640  ;;  %p643_p1 = scmp.lt.s32.totalorder %s32_s25, %s32_s25 }
   0x6   :  { %p639_p0 = scmp.ne.s32.totalorder %s32_s25, %s638_s26  ;;  %p644_p2 = scmp.lt.s32.totalorder %s638_s26, %s638_s26 }
   0x8   :  { %p645_p3 = por %p644_p2, %p643_p1 }
   0xa   :  { %p646_p4 = pnand %p645_p3, %p639_p0 }
   0xc   :  { %649 = shalt.err (!%p646_p4)
}
   0xd   :  { %s759_s27 = smov 64   ;;  %s760_s28 = smov 4  }
   0xe   :  { %37 = dma.hbm_to_vmem [thread:$0]  %s865_s1, 640, %s32_s25, [#allocation6], %s759_s27, %s759_s27, %s760_s28  }
   0xf   :  { %s761_s8 = smov [#allocation8]  }
  0x10   :  { %s53_s9 = sshll.u32 %s761_s8, 4  ;;  %s54_s9 = int_to_ptr.vmem [resolvable:$true] %s53_s9 }
  0x11   :  { %s658_s10 = scalar_lea.vmem %s54_s9, 512  ;;  %p663_p6 = scmp.lt.s32.totalorder %s54_s9, %s54_s9 }
  0x12   :  { %p659_p5 = scmp.ne.s32.totalorder %s54_s9, %s658_s10  ;;  %p664_p7 = scmp.lt.s32.totalorder %s658_s10, %s658_s10 }
  0x14   :  { %p665_p8 = por %p664_p7, %p663_p6 }
  0x16   :  { %p666_p9 = pnand %p665_p8, %p659_p5 }
  0x18   :  { %669 = shalt.err (!%p666_p9)
}
  0x19   :  { %s762_s11 = smov 128   ;;  %s763_s12 = smov 8  }
  0x1a   :  { %59 = dma.hbm_to_vmem [thread:$0]  %s867_s3, 512, %s54_s9, [#allocation9], %s762_s11, %s762_s11, %s763_s12  }
  0x1b   :  { %s764_s1 = smov [#allocation2]   ;;  %s765_s16 = smov [#allocation7]  }
  0x1c   :  { %s22_s15 = sshll.u32 %s764_s1, 4  ;;  %s44_s17 = sshll.u32 %s765_s16, 4  ;;  %s23_s15 = int_to_ptr.vmem [resolvable:$true] %s22_s15  ;;  %s45_s17 = int_to_ptr.vmem [resolvable:$true] %s44_s17 }
  0x1d   :  { %s678_s18 = scalar_lea.vmem %s23_s15, 64  ;;  %p683_p11 = scmp.lt.s32.totalorder %s23_s15, %s23_s15 }
  0x1e   :  { %p679_p10 = scmp.ne.s32.totalorder %s23_s15, %s678_s18  ;;  %p684_p12 = scmp.lt.s32.totalorder %s678_s18, %s678_s18 }
  0x20   :  { %p685_p13 = por %p684_p12, %p683_p11 }
  0x22   :  { %p686_p0 = pnand %p685_p13, %p679_p10 }
  0x24   :  { %689 = shalt.err (!%p686_p0)
}
  0x25   :  { %25 = dma.hbm_to_vmem [thread:$0]  %s864_s0, 64, %s23_s15, [#allocation3]  }
  0x26   :  { %s698_s21 = scalar_lea.vmem %s45_s17, 64  ;;  %p703_p2 = scmp.lt.s32.totalorder %s45_s17, %s45_s17 }
  0x27   :  { %p699_p1 = scmp.ne.s32.totalorder %s45_s17, %s698_s21  ;;  %p704_p3 = scmp.lt.s32.totalorder %s698_s21, %s698_s21 }
  0x29   :  { %p705_p4 = por %p704_p3, %p703_p2 }
  0x2b   :  { %p706_p5 = pnand %p705_p4, %p699_p1 }
  0x2d   :  { %709 = shalt.err (!%p706_p5)
}
  0x2e   :  { %47 = dma.hbm_to_vmem [thread:$0]  %s866_s2, 64, %s45_s17, [#allocation6]  }
  0x2f   :  { %s766_s23 = smov [#allocation10]  }
  0x30   :  { %s65_s24 = sshll.u32 %s766_s23, 4  ;;  %s66_s24 = int_to_ptr.vmem [resolvable:$true] %s65_s24 }
  0x31   :  { %s718_s25 = scalar_lea.vmem %s66_s24, 512  ;;  %p723_p7 = scmp.lt.s32.totalorder %s66_s24, %s66_s24 }
  0x32   :  { %p719_p6 = scmp.ne.s32.totalorder %s66_s24, %s718_s25  ;;  %p724_p8 = scmp.lt.s32.totalorder %s718_s25, %s718_s25 }
  0x34   :  { %p725_p9 = por %p724_p8, %p723_p7 }
  0x36   :  { %p726_p10 = pnand %p725_p9, %p719_p6 }
  0x38   :  { %729 = shalt.err (!%p726_p10)
}
  0x39   :  { %71 = dma.hbm_to_vmem [thread:$0]  %s868_s4, 512, %s66_s24, [#allocation9], %s762_s11, %s762_s11, %s763_s12  }
  0x3a   :  { %750 = dma.done.wait [#allocation3], 64  }
  0x3b   :  { %751 = vsyncadd [#allocation3], 4294967232 }
  0x3c   :  { %752 = dma.done.wait [#allocation6], 704  }
  0x3d   :  { %753 = vsyncadd [#allocation6], 4294966592 }
  0x3e   :  { %754 = dma.done.wait [#allocation9], 1024  }
  0x3f   :  { %755 = vsyncadd [#allocation9], 4294966272  ;;  %v767_v0 = vmov 0.0   ;;  %vm768_vm0 = vmmov 0   ;;  %v95_v1 = vld [vmem:[#allocation8 + $0x18] sm:$0xff]  ;;  %v94_v3 = vld [vmem:[#allocation8 + $0x10] sm:$0xff] }
  0x40   :  { %547 = vmatprep.subr.mxu0 %v767_v0  ;;  %581 = vmatprep.subr.mxu1 %v767_v0  ;;  %v190_v2 = vld [vmem:[#allocation10 + $0x18] sm:$0xff]  ;;  %v189_v4 = vld [vmem:[#allocation10 + $0x10] sm:$0xff]  ;;  %v93_v5 = vld [vmem:[#allocation8 + $0x8] sm:$0xff]  ;;  %vm103_vm1 = vcmask 261120   ;;  %vm358_vm2 = vcmask 257024   ;;  %vm441_vm3 = vcmask 1041409  }
  0x41   :  { %555 = vmatprep.mubr.msk.f32.mxu0 %vm768_vm0, %v767_v0  ;;  %569 = vmatprep.mubr.msk.f32.mxu1 %vm768_vm0, %v767_v0  ;;  %v188_v6 = vld [vmem:[#allocation10 + $0x8] sm:$0xff]  ;;  %v92_v7 = vld [vmem:[#allocation8] sm:$0xff]  ;;  %v91_v9 = vld [vmem:[#allocation2] sm:$0xf]  ;;  %vm443_vm4 = vcmask 1042434   ;;  %vm445_vm5 = vcmask 1043459  }
  0x42   :  { %548 = vmatpush3.msra.mxu0 %v95_v1  ;;  %585 = vmatpush3.msra.mxu1 %v190_v2  ;;  %v187_v8 = vld [vmem:[#allocation10] sm:$0xff]  ;;  %v603_v12 = vld [vmem:[#allocation5] sm:$0xff]   ;;  %v604_v13 = vld [vmem:[#allocation5 + $0x18] sm:$0xff]   ;;  %vm447_vm6 = vcmask 1044484   ;;  %vm449_vm7 = vcmask 1045509   ;;  %vm451_vm8 = vcmask 1046534  }
  0x43   :  { %549 = vmatprep.subr.mxu0 %v767_v0  ;;  %582 = vmatprep.subr.mxu1 %v767_v0  ;;  %v601_v10 = vld [vmem:[#allocation5 + $0x8] sm:$0xff]   ;;  %v602_v11 = vld [vmem:[#allocation5 + $0x10] sm:$0xff]   ;;  %v605_v14 = vld [vmem:[#allocation5 + $0x20] sm:$0xff]   ;;  %vm453_vm9 = vcmask 1047559   ;;  %vm493_vm11 = vcmask 80896   ;;  %vm495_vm12 = vcmask 1043456  }
  0x44   :  { %550 = vmatpush3.msra.mxu0 %v94_v3  ;;  %586 = vmatpush3.msra.mxu1 %v189_v4  ;;  %v525_v15 = vld [vmem:[%s869_s5] ss:$0 sm:$0xff] }
  0x45   :  { %551 = vmatprep.subr.mxu0 %v767_v0  ;;  %583 = vmatprep.subr.mxu1 %v767_v0  ;;  %v532_v44 = vld [vmem:[%s870_s6] ss:$0 sm:$0xff]  ;;  %s769_s6 = smov [#allocation11]  }
  0x46   :  { %552 = vmatpush3.msra.mxu0 %v93_v5  ;;  %587 = vmatpush3.msra.mxu1 %v188_v6  ;;  %s514_s28 = sshll.u32 %s769_s6, 4  ;;  %s515_s28 = int_to_ptr.vmem [resolvable:$true] %s514_s28 }
  0x47   :  { %553 = vmatprep.subr.mxu0 %v767_v0  ;;  %584 = vmatprep.subr.mxu1 %v767_v0  ;;  %s730_s29 = scalar_lea.vmem %s515_s28, 64  ;;  %p735_p12 = scmp.lt.s32.totalorder %s515_s28, %s515_s28 }
  0x48   :  { %554 = vmatpush3.msra.mxu0 %v92_v7  ;;  %588 = vmatpush3.msra.mxu1 %v187_v8  ;;  %p731_p11 = scmp.ne.s32.totalorder %s515_s28, %s730_s29  ;;  %p736_p13 = scmp.lt.s32.totalorder %s730_s29, %s730_s29 }
  0x49   :  { %556 = vmatmul.mubr.msk.f32.vlgmr.msra.gmra.mxu0 %vm103_vm1, %v91_v9  ;;  %558 = vmatprep.subr.mxu0 %v767_v0 }
  0x4a   :  { %570 = vmatmul.mubr.msk.f32.vlgmr.msra.gmra.mxu1 %vm103_vm1, %v601_v10  ;;  %559 = vmatpush3.msra.mxu0 %v190_v2  ;;  %p737_p0 = por %p736_p13, %p735_p12 }
  0x4b   :  { %560 = vmatprep.subr.mxu0 %v767_v0  ;;  %572 = vmatprep.mubr.msk.f32.mxu1 %vm768_vm0, %v767_v0 }
  0x4c   :  { %561 = vmatpush3.msra.mxu0 %v189_v4  ;;  %566 = vmatprep.mubr.msk.f32.mxu0 %vm768_vm0, %v767_v0  ;;  %p738_p1 = pnand %p737_p0, %p731_p11 }
  0x4d   :  { %562 = vmatprep.subr.mxu0 %v767_v0 }
  0x4e   :  { %573 = vmatmul.mubr.msk.f32.gmra.mxu1 %vm103_vm1, %v602_v11  ;;  %563 = vmatpush3.msra.mxu0 %v188_v6 }
  0x4f   :  { %564 = vmatprep.subr.mxu0 %v767_v0  ;;  %575 = vmatprep.mubr.msk.f32.mxu1 %vm768_vm0, %v767_v0 }
  0x50   :  { %565 = vmatpush3.msra.mxu0 %v187_v8 }
  0x51   :  { %567 = vmatmul.mubr.msk.f32.vlgmr.msra.gmra.mxu0 %vm103_vm1, %v603_v12  ;;  %v399_v12 = vlaneseq }
  0x52   :  { %576 = vmatmul.mubr.msk.f32.gmra.mxu1 %vm103_vm1, %v604_v13 }
  0x53   :  { %578 = vmatprep.mubr.msk.f32.mxu1 %vm768_vm0, %v767_v0 }
  0x56   :  { %579 = vmatmul.mubr.msk.f32.gmra.mxu1 %vm103_vm1, %v605_v14 }
 0x109   :  { %v173_v16 = vpop.f32.mrf.mxu0 }
 0x10a   :  { %v174_v17 = vadd.f32 %v525_v15, %v173_v16  ;;  %v287_v18 = vpop.f32.mrf.mxu1  ;;  %v400_v15 = vand.u32 127, %v399_v12  ;;  %v402_v16 = vshrl.u32 %v399_v12, 7 }
 0x10b   :  { %v312_v19 = vcombine.high %v287_v18, %v287_v18  ;;  %v557_v20 = vpop.f32.mrf.mxu0 }
 0x10c   :  { %v323_v21 = vadd.f32 %v287_v18, %v174_v17  ;;  %v571_v22 = vpop.f32.mrf.mxu1 }
 0x10d   :  { %v324_v23 = vadd.f32 %v312_v19, %v174_v17  ;;  %v403_v19 = vsub.s32 %v400_v15, %v402_v16 }
 0x10e   :  { %606 = vtanh.f32 %v323_v21  ;;  %v292_v24 = vpop.f32.mrf.mxu1 }
 0x10f   :  { %608 = vtanh.f32 %v324_v23  ;;  %v313_v25 = vcombine.high %v292_v24, %v292_v24  ;;  %v325_v26 = vadd.f32 %v292_v24, %v174_v17 }
 0x110   :  { %v574_v27 = vpop.f32.mrf.mxu1 }
 0x111   :  { %v326_v28 = vadd.f32 %v313_v25, %v174_v17  ;;  %610 = vtanh.f32 %v325_v26  ;;  %v282_v29 = vpop.f32.mrf.mxu0 }
 0x112   :  { %v311_v30 = vcombine.high %v282_v29, %v282_v29  ;;  %v321_v31 = vadd.f32 %v282_v29, %v174_v17  ;;  %v297_v32 = vpop.f32.mrf.mxu1 }
 0x113   :  { %612 = vtanh.f32 %v326_v28  ;;  %v314_v33 = vcombine.high %v297_v32, %v297_v32  ;;  %v568_v34 = vpop.f32.mrf.mxu0  ;;  %v327_v37 = vadd.f32 %v297_v32, %v174_v17 }
 0x114   :  { %v322_v35 = vadd.f32 %v311_v30, %v174_v17  ;;  %614 = vtanh.f32 %v321_v31  ;;  %v577_v36 = vpop.f32.mrf.mxu1 }
 0x115   :  { %v328_v38 = vadd.f32 %v314_v33, %v174_v17 }
 0x116   :  { %616 = vtanh.f32 %v322_v35  ;;  %v302_v39 = vpop.f32.mrf.mxu1 }
 0x117   :  { %618 = vtanh.f32 %v328_v38  ;;  %v315_v40 = vcombine.high %v302_v39, %v302_v39  ;;  %v329_v42 = vadd.f32 %v302_v39, %v174_v17 }
 0x118   :  { %v580_v41 = vpop.f32.mrf.mxu1  ;;  %620 = vtanh.f32 %v327_v37 }
 0x119   :  { %v330_v43 = vadd.f32 %v315_v40, %v174_v17 }
 0x11b   :  { %v607_v45 = vpop.eup %606  ;;  %622 = vtanh.f32 %v330_v43  ;;  %v490_v43 = vld [vmem:[#allocation7] sm:$0xf] }
 0x11c   :  { %v609_v46 = vpop.eup %608  ;;  %v350_v47 = vmul.f32 %v607_v45, %v532_v44  ;;  %624 = vtanh.f32 %v329_v42  ;;  %vm491_vm10 = vcmp.eq.f32.partialorder %v490_v43, 0.0 }
 0x11d   :  { %v351_v50 = vmul.f32 %v609_v46, %v532_v44 }
 0x11e   :  { %v611_v48 = vpop.eup %610  ;;  %v365_v49 = vsel %vm358_vm2, %v350_v47, 0.0 }
 0x11f   :  { %366 = vadd.xlane.f32.xlu1 %v365_v49  ;;  %v352_v51 = vmul.f32 %v611_v48, %v532_v44  ;;  %v368_v55 = vsel %vm358_vm2, %v351_v50, 0.0 }
 0x120   :  { %v613_v52 = vpop.eup %612 }
 0x121   :  { %v615_v53 = vpop.eup %614  ;;  %v371_v54 = vsel %vm358_vm2, %v352_v51, 0.0  ;;  %v353_v57 = vmul.f32 %v613_v52, %v532_v44 }
 0x122   :  { %372 = vadd.xlane.f32.xlu0 %v371_v54  ;;  %v348_v56 = vmul.f32 %v615_v53, %v532_v44 }
 0x123   :  { %v617_v58 = vpop.eup %616  ;;  %369 = vadd.xlane.f32.xlu1 %v368_v55  ;;  %v374_v63 = vsel %vm358_vm2, %v353_v57, 0.0 }
 0x124   :  { %v619_v59 = vpop.eup %618  ;;  %v359_v60 = vsel %vm358_vm2, %v348_v56, 0.0  ;;  %v349_v61 = vmul.f32 %v617_v58, %v532_v44 }
 0x125   :  { %v621_v62 = vpop.eup %620  ;;  %v355_v0 = vmul.f32 %v619_v59, %v532_v44 }
 0x126   :  { %360 = vadd.xlane.f32.xlu0 %v359_v60  ;;  %v362_v2 = vsel %vm358_vm2, %v349_v61, 0.0  ;;  %v354_v3 = vmul.f32 %v621_v62, %v532_v44 }
 0x127   :  { %375 = vadd.xlane.f32.xlu1 %v374_v63  ;;  %v380_v5 = vsel %vm358_vm2, %v355_v0, 0.0 }
 0x128   :  { %v623_v1 = vpop.eup %622  ;;  %v377_v7 = vsel %vm358_vm2, %v354_v3, 0.0 }
 0x129   :  { %v625_v4 = vpop.eup %624  ;;  %v357_v6 = vmul.f32 %v623_v1, %v532_v44 }
 0x12a   :  { %363 = vadd.xlane.f32.xlu0 %v362_v2  ;;  %v356_v8 = vmul.f32 %v625_v4, %v532_v44 }
 0x12b   :  { %381 = vadd.xlane.f32.xlu1 %v380_v5  ;;  %v386_v9 = vsel %vm358_vm2, %v357_v6, 0.0 }
 0x12c   :  { %v383_v10 = vsel %vm358_vm2, %v356_v8, 0.0 }
 0x12e   :  { %378 = vadd.xlane.f32.xlu0 %v377_v7 }
 0x12f   :  { %387 = vadd.xlane.f32.xlu1 %v386_v9 }
 0x132   :  { %384 = vadd.xlane.f32.xlu0 %v383_v10 }
 0x1a8   :  { %v367_v11 = vpop.xlane.xlu1 %366 }
 0x1a9   :  { %v412_v23 = vrot.slane %v367_v11, %v403_v19 }
 0x1ab   :  { %v373_v13 = vpop.xlane.xlu0 %372 }
 0x1ac   :  { %v370_v14 = vpop.xlane.xlu1 %369  ;;  %v420_v27 = vrot.slane %v373_v13, %v403_v19 }
 0x1ad   :  { %v416_v25 = vrot.slane %v370_v14, %v403_v19 }
 0x1af   :  { %v361_v17 = vpop.xlane.xlu0 %360 }
 0x1b0   :  { %v376_v18 = vpop.xlane.xlu1 %375  ;;  %v404_v21 = vrot.slane %v361_v17, %v403_v19 }
 0x1b1   :  { %v424_v30 = vrot.slane %v376_v18, %v403_v19 }
 0x1b3   :  { %v364_v20 = vpop.xlane.xlu0 %363 }
 0x1b4   :  { %v408_v22 = vrot.slane %v364_v20, %v403_v19  ;;  %v382_v24 = vpop.xlane.xlu1 %381 }
 0x1b5   :  { %v432_v34 = vrot.slane %v382_v24, %v403_v19 }
 0x1b6   :  { %v442_v26 = vsel %vm441_vm3, %v408_v22, %v404_v21 }
 0x1b7   :  { %v444_v28 = vsel %vm443_vm4, %v412_v23, %v442_v26  ;;  %v379_v29 = vpop.xlane.xlu0 %378 }
 0x1b8   :  { %v428_v31 = vrot.slane %v379_v29, %v403_v19  ;;  %v446_v32 = vsel %vm445_vm5, %v416_v25, %v444_v28  ;;  %v388_v36 = vpop.xlane.xlu1 %387 }
 0x1b9   :  { %v448_v33 = vsel %vm447_vm6, %v420_v27, %v446_v32  ;;  %v440_v41 = vrot.slane %v388_v36, %v403_v19 }
 0x1ba   :  { %v450_v35 = vsel %vm449_vm7, %v424_v30, %v448_v33 }
 0x1bb   :  { %v385_v37 = vpop.xlane.xlu0 %384  ;;  %v452_v38 = vsel %vm451_vm8, %v428_v31, %v450_v35 }
 0x1bc   :  { %v436_v39 = vrot.slane %v385_v37, %v403_v19  ;;  %v454_v40 = vsel %vm453_vm9, %v432_v34, %v452_v38 }
 0x1bd   :  { %458 = vxpose.xlu0.b32.start [1/2] (short) (narrow) %v454_v40, 8 }
 0x1be   :  { %v455_v42 = vsel %vm441_vm3, %v440_v41, %v436_v39 }
 0x1c1   :  { %459 = vxpose.xlu0.b32.end [2/2] (short) (narrow) %v455_v42, 8 }
 0x239   :  { %v474_v44 = vpop.trf.xlu0 }
 0x23a   :  { %v492_v45 = vsel %vm491_vm10, -1e+10, %v474_v44 }
 0x23b   :  { %v494_v46 = vsel %vm493_vm11, %v492_v45, -3.4028235e+38 }
 0x23c   :  { %v496_v47 = vsel %vm495_vm12, %v494_v46, -inf }
 0x23d   :  { %497 = vmax.xlane.f32.xlu1 %v496_v47 }
 0x2c6   :  { %v498_v48 = vpop.xlane.xlu1 %497 }
 0x2c7   :  { %v499_v49 = vsub.f32 %v494_v46, %v498_v48 }
 0x2c9   :  { %v500_v50 = vmul.f32 1.442695, %v499_v49 }
 0x2cb   :  { %626 = vpow2.f32 %v500_v50 }
 0x2d8   :  { %v627_v51 = vpop.eup %626 }
 0x2d9   :  { %v502_v52 = vsel %vm495_vm12, %v627_v51, 0.0 }
 0x2da   :  { %503 = vadd.xlane.f32.xlu1 %v502_v52 }
 0x363   :  { %v504_v53 = vpop.xlane.xlu1 %503 }
 0x364   :  { %628 = vrcp.f32 %v504_v53 }
 0x371   :  { %v629_v54 = vpop.eup %628 }
 0x372   :  { %v506_v55 = vmul.f32 %v629_v54, %v627_v51 }
 0x374   :  { %507 = vst [vmem:[#allocation11] sm:$0xf] %v506_v55 }
 0x375   :  { %741 = shalt.err (!%p738_p1)
}
 0x376   :  { %517 = dma.vmem_to_hbm [thread:$0]  %s515_s28, 64, %s871_s7, [#allocation4]  }
 0x377   :  { %756 = dma.done.wait [#allocation4], 64  }
 0x378   :  { %757 = vsyncadd [#allocation4], 4294967232 }
 0x379   :  { %521 = vsyncpa [#allocation3], 1 }
 0x37a   :  { %522 = vsyncpa [#allocation6], 1 }
 0x37b   :  { %523 = vsyncpa [#allocation9], 1 }
 0x37c   :  { %524 = vsyncpa [#allocation4], 1 }

</bundles_post_ra>
